<compile_context>
chip_gen: v7x
topology: tpu7x:2x2x1
jax: 0.10.0
libtpu: 0.0.40
codegen_flags: <defaults>
</compile_context>

<pallas_src>
import functools

import jax
import jax.numpy as jnp
from jax.experimental import pallas as pl
from jax.experimental.pallas import tpu as pltpu

C_IN = 64
C_OUT = 64
K = 3


def _vmem_limit_bytes():
    """Per-generation VMEM budget: ~3/4 of physical, capped at 96 MiB
    (-> ~48 MiB on v7x's 64 MiB, 96 MiB on v5e/v6e's 128 MiB)."""
    try:
        cap = int(pltpu.get_tpu_info().vmem_capacity_bytes)
        return min(cap * 3 // 4, 96 * 1024 * 1024)
    except Exception:
        return 48 * 1024 * 1024  # conservative: fits every generation


def _pick_rows(H, W, max_pixels):
    """Largest divisor R of H whose output strip fits the per-block pixel budget
    and keeps the output block lane-dense (R*W % 128 == 0).  Falls back to
    whole-image blocks (R == H) when the image is small or no divisor works."""
    best = None
    for r in range(1, H + 1):
        if H % r:
            continue
        npix = r * W
        if npix <= max_pixels and (npix % 128 == 0 or r == H):
            best = r
    return best if best is not None else H


@functools.partial(jax.jit, static_argnames=("max_pixels_per_strip",))
def conv_relu_block(x_nchw, w_oihw, b, *, max_pixels_per_strip=8192):
    """x_nchw: (N, 64, H, W) f32; w_oihw: (64, 64, 3, 3) PyTorch OIHW; b: (64,)."""
    N, C, H, W = x_nchw.shape
    assert C == C_IN
    assert w_oihw.shape == (C_OUT, C_IN, K, K)

    R = _pick_rows(H, W, max_pixels_per_strip)     # output rows per strip
    S = H // R                                     # strips per image
    NPIX = R * W                                   # output pixels per block
    PFLAT = (R + 2) * W                            # packed slab length (1-row halo each side)
    SRC_FLAT = (R + 4) * W                         # input slab (2 extra rows so every
                                                   # static shift window start is >= 0)

    # One fused pass over the activations: pad H by 2 rows each side, cast to bf16
    # (halves DMA bytes + VMEM), and for S > 1 gather the overlapping row strips
    # (the duplicated halo rows are the price of non-overlapping BlockSpec windows,
    # ~4/R overhead).  All of this fuses into a single read-f32 / write-bf16 pass.
    x_pad = jnp.pad(x_nchw, ((0, 0), (0, 0), (2, 2), (0, 0))).astype(jnp.bfloat16)
    if S == 1:
        x_strips = x_pad.reshape(N, 1, C_IN, SRC_FLAT)
    else:
        row_idx = jnp.arange(S)[:, None] * R + jnp.arange(R + 4)[None, :]
        x_strips = x_pad[:, :, row_idx, :]                       # (N, C, S, R+4, W)
        x_strips = jnp.transpose(x_strips, (0, 2, 1, 3, 4)).reshape(N, S, C_IN, SRC_FLAT)

    # Weights packed for a K=192 contraction: w_packed[ky] is (C_OUT, 3*C_IN) with
    # the last axis ordered (kx, cin) to match the [x-1 | x | x+1] slab stacking.
    w_packed = jnp.transpose(w_oihw, (2, 0, 3, 1)).reshape(K, C_OUT, K * C_IN)
    w_packed = w_packed.astype(jnp.bfloat16)
    b2 = b.reshape(C_OUT, 1).astype(jnp.float32)

    def kernel(x_ref, w_ref, b_ref, o_ref, packed_ref):
        # x_ref:      (C_IN, (R+4)*W) bf16      w_ref: (K, C_OUT, 3*C_IN) bf16
        # b_ref:      (C_OUT, 1) f32            o_ref: (C_OUT, NPIX) f32
        # packed_ref: (3*C_IN, (R+2)*W) bf16 VMEM scratch
        x = x_ref[...]

        # Hoisted once per block: the three column-shifted copies of the strip.
        # Without W padding, the x-1 / x+1 reads at the image borders wrap into
        # the neighbouring row of the flat layout -> zero them here so the tap
        # loop below is a pure dot-accumulate chain.
        col = jax.lax.broadcasted_iota(jnp.int32, (1, PFLAT), 1) % W
        center = x[:, W:W + PFLAT]
        xm1 = x[:, W - 1:W - 1 + PFLAT]          # value at column  x-1
        xp1 = x[:, W + 1:W + 1 + PFLAT]          # value at column  x+1
        zero = jnp.zeros_like(center)
        xm1 = jnp.where(col == 0, zero, xm1)
        xp1 = jnp.where(col == W - 1, zero, xp1)

        packed_ref[0 * C_IN:1 * C_IN, :] = xm1
        packed_ref[1 * C_IN:2 * C_IN, :] = center
        packed_ref[2 * C_IN:3 * C_IN, :] = xp1

        # 3 dots with K=192 instead of 9 with K=64.  Bias is applied in the
        # epilogue (keeps the accumulate chain pure for v7x's MRB).
        acc = jnp.dot(w_ref[0], packed_ref[:, 0:NPIX],
                      preferred_element_type=jnp.float32)
        for ky in range(1, K):
            acc = acc + jnp.dot(w_ref[ky], packed_ref[:, ky * W:ky * W + NPIX],
                                preferred_element_type=jnp.float32)

        o_ref[...] = jnp.maximum(acc + b_ref[...], 0.0).astype(o_ref.dtype)

    # Grid: (batch, row-strips) — both independent, both "parallel" (megacore can
    # shard the strip axis on v7x even when N is 1 or odd).  For tiny images the
    # whole image is a single strip, so per-image overhead is one grid step.
    out_flat = pl.pallas_call(
        kernel,
        out_shape=jax.ShapeDtypeStruct((N, C_OUT, H * W), jnp.float32),
        grid_spec=pltpu.PrefetchScalarGridSpec(
            num_scalar_prefetch=0,
            grid=(N, S),
            in_specs=[
                pl.BlockSpec((pl.Squeezed(), pl.Squeezed(), C_IN, SRC_FLAT),
                             lambda n, s: (n, s, 0, 0)),
                pl.BlockSpec((K, C_OUT, K * C_IN), lambda n, s: (0, 0, 0)),
                pl.BlockSpec((C_OUT, 1), lambda n, s: (0, 0)),
            ],
            out_specs=pl.BlockSpec((pl.Squeezed(), C_OUT, NPIX),
                                   lambda n, s: (n, 0, s)),
            scratch_shapes=[pltpu.VMEM((K * C_IN, PFLAT), jnp.bfloat16)],
        ),
        compiler_params=pltpu.CompilerParams(
            dimension_semantics=("parallel", "parallel"),
            vmem_limit_bytes=_vmem_limit_bytes(),
        ),
    )(x_strips, w_packed, b2)

    # (N, C_out, H*W) -> (N, C_out, H, W): free reshape, already NCHW.
    return out_flat.reshape(N, C_OUT, H, W)


def _reference(x_nchw, w_oihw, b):
    y = jax.lax.conv_general_dilated(
        x_nchw, w_oihw, window_strides=(1, 1), padding=((1, 1), (1, 1)),
        dimension_numbers=("NCHW", "OIHW", "NCHW"),
        precision=jax.lax.Precision.HIGHEST)
    return jnp.maximum(y + b.reshape(1, C_OUT, 1, 1), 0.0)


if __name__ == "__main__":
    key = jax.random.PRNGKey(0)
    k1, k2, k3, k4 = jax.random.split(key, 4)

    # Channels are fixed at 64 by the module's __init__; keep spatial small.
    fan_in = C_IN * K * K
    bound = 1.0 / (fan_in ** 0.5)
    w = jax.random.uniform(k2, (C_OUT, C_IN, K, K), dtype=jnp.float32,
                           minval=-bound, maxval=bound)          # PyTorch OIHW
    b = jax.random.uniform(k3, (C_OUT,), dtype=jnp.float32,
                           minval=-bound, maxval=bound)
    w_bf = w.astype(jnp.bfloat16).astype(jnp.float32)

    def check(x, **kw):
        out = jax.block_until_ready(conv_relu_block(x, w, b, **kw))
        assert out.shape == x.shape
        # Tight check: reference with the same bf16-rounded operands (the kernel
        # feeds the MXU bf16 with f32 accumulation) — isolates structural bugs.
        x_bf = x.astype(jnp.bfloat16).astype(jnp.float32)
        ref_bf = jax.block_until_ready(_reference(x_bf, w_bf, b))
        err = float(jnp.max(jnp.abs(out - ref_bf)))
        assert jnp.allclose(out, ref_bf, atol=2e-3, rtol=2e-3), (
            f"mismatch vs bf16-matched reference: max abs diff = {err}")
        # Loose sanity check vs the full-f32 reference (bf16 operand rounding).
        ref32 = jax.block_until_ready(_reference(x, w, b))
        assert jnp.allclose(out, ref32, atol=5e-2, rtol=5e-2), \
            "gross mismatch vs f32 reference"

    # 1) Single-strip path: whole 16x16 image per block (one grid step / image).
    x1 = jax.random.normal(k1, (2, C_IN, 16, 16), dtype=jnp.float32)
    check(x1)

    # 2) Multi-strip path: 32x16 image split into two 16-row strips; exercises the
    #    halo duplication across the strip seam and the strided output blocks.
    x2 = jax.random.normal(k4, (1, C_IN, 32, 16), dtype=jnp.float32)
    check(x2, max_pixels_per_strip=256)

    print("KERNEL_OK")
</pallas_src>

<mosaic_0001>
module attributes {stable_mosaic.version = 11 : i64} {
  func.func @kernel(%arg0: i32, %arg1: i32, %arg2: memref<1x1x64x320xbf16, #tpu.memory_space<vmem>>, %arg3: memref<3x64x192xbf16, #tpu.memory_space<vmem>>, %arg4: memref<64x1xf32, #tpu.memory_space<vmem>>, %arg5: memref<1x64x256xf32, #tpu.memory_space<vmem>>, %arg6: memref<192x288xbf16, #tpu.memory_space<vmem>>) attributes {dimension_semantics = [#tpu.dimension_semantics<parallel>, #tpu.dimension_semantics<parallel>], iteration_bounds = array<i64: 2, 1>, scalar_prefetch = 0 : i64, scratch_operands = 1 : i64, tpu.core_type = #tpu.core_type<tc>, window_params = [{transform_indices = @transform_0, window_bounds = array<i64: 1, 1, 64, 320>}, {pipeline_mode = #tpu.pipeline_mode<synchronous>, transform_indices = @transform_1, window_bounds = array<i64: 3, 64, 192>}, {pipeline_mode = #tpu.pipeline_mode<synchronous>, transform_indices = @transform_2, window_bounds = array<i64: 64, 1>}, {transform_indices = @transform_3, window_bounds = array<i64: 1, 64, 256>}]} {
    %c0 = arith.constant 0 : index
    %c0_0 = arith.constant 0 : index
    %c0_1 = arith.constant 0 : index
    %c0_2 = arith.constant 0 : index
    %0 = vector.load %arg2[%c0, %c0_0, %c0_1, %c0_2] : memref<1x1x64x320xbf16, #tpu.memory_space<vmem>>, vector<1x1x64x320xbf16>
    %1 = vector.shape_cast %0 : vector<1x1x64x320xbf16> to vector<64x320xbf16>
    %2 = tpu.iota {dimensions = array<i32: 1>} : vector<1x288xi32>
    %c16_i32 = arith.constant 16 : i32
    %c0_i32 = arith.constant 0 : i32
    %3 = arith.cmpi eq, %c16_i32, %c0_i32 : i32
    %c1_i32 = arith.constant 1 : i32
    %4 = arith.select %3, %c1_i32, %c16_i32 : i32
    %5 = vector.broadcast %4 : i32 to vector<1x288xi32>
    %6 = arith.remsi %2, %5 : vector<1x288xi32>
    %c0_i32_3 = arith.constant 0 : i32
    %7 = vector.broadcast %c0_i32_3 : i32 to vector<1x288xi32>
    %8 = arith.cmpi ne, %6, %7 : vector<1x288xi32>
    %c0_i32_4 = arith.constant 0 : i32
    %9 = vector.broadcast %c0_i32_4 : i32 to vector<1x288xi32>
    %10 = arith.cmpi slt, %6, %9 : vector<1x288xi32>
    %c0_i32_5 = arith.constant 0 : i32
    %11 = arith.cmpi slt, %4, %c0_i32_5 : i32
    %12 = vector.broadcast %11 : i1 to vector<1x288xi1>
    %13 = vector.broadcast %12 : vector<1x288xi1> to vector<1x288xi1>
    %14 = arith.xori %10, %13 : vector<1x288xi1>
    %15 = arith.andi %14, %8 : vector<1x288xi1>
    %16 = vector.broadcast %4 : i32 to vector<1x288xi32>
    %17 = arith.addi %6, %16 : vector<1x288xi32>
    %18 = arith.select %15, %17, %6 : vector<1x288xi1>, vector<1x288xi32>
    %19 = vector.extract_strided_slice %1 {offsets = [0, 16], sizes = [64, 288], strides = [1, 1]} : vector<64x320xbf16> to vector<64x288xbf16>
    %20 = vector.extract_strided_slice %1 {offsets = [0, 15], sizes = [64, 288], strides = [1, 1]} : vector<64x320xbf16> to vector<64x288xbf16>
    %21 = vector.extract_strided_slice %1 {offsets = [0, 17], sizes = [64, 288], strides = [1, 1]} : vector<64x320xbf16> to vector<64x288xbf16>
    %cst = arith.constant 0.000000e+00 : bf16
    %22 = vector.broadcast %cst : bf16 to vector<64x288xbf16>
    %c0_i32_6 = arith.constant 0 : i32
    %23 = vector.broadcast %c0_i32_6 : i32 to vector<1x288xi32>
    %24 = arith.cmpi eq, %18, %23 : vector<1x288xi32>
    %25 = vector.shape_cast %24 : vector<1x288xi1> to vector<1x288xi1>
    %26 = vector.broadcast %25 : vector<1x288xi1> to vector<64x288xi1>
    %27 = arith.select %26, %22, %20 : vector<64x288xi1>, vector<64x288xbf16>
    %c15_i32 = arith.constant 15 : i32
    %28 = vector.broadcast %c15_i32 : i32 to vector<1x288xi32>
    %29 = arith.cmpi eq, %18, %28 : vector<1x288xi32>
    %30 = vector.shape_cast %29 : vector<1x288xi1> to vector<1x288xi1>
    %31 = vector.broadcast %30 : vector<1x288xi1> to vector<64x288xi1>
    %32 = arith.select %31, %22, %21 : vector<64x288xi1>, vector<64x288xbf16>
    %c0_7 = arith.constant 0 : index
    %c0_8 = arith.constant 0 : index
    %33 = vector.load %arg6[%c0_7, %c0_8] : memref<192x288xbf16, #tpu.memory_space<vmem>>, vector<64x288xbf16>
    tpu.vector_store %arg6[%c0_7, %c0_8], %27 {strides = array<i32>} : memref<192x288xbf16, #tpu.memory_space<vmem>>, vector<64x288xbf16>,
    %c64 = arith.constant 64 : index
    %c0_9 = arith.constant 0 : index
    %34 = vector.load %arg6[%c64, %c0_9] : memref<192x288xbf16, #tpu.memory_space<vmem>>, vector<64x288xbf16>
    tpu.vector_store %arg6[%c64, %c0_9], %19 {strides = array<i32>} : memref<192x288xbf16, #tpu.memory_space<vmem>>, vector<64x288xbf16>,
    %c128 = arith.constant 128 : index
    %c0_10 = arith.constant 0 : index
    %35 = vector.load %arg6[%c128, %c0_10] : memref<192x288xbf16, #tpu.memory_space<vmem>>, vector<64x288xbf16>
    tpu.vector_store %arg6[%c128, %c0_10], %32 {strides = array<i32>} : memref<192x288xbf16, #tpu.memory_space<vmem>>, vector<64x288xbf16>,
    %c0_11 = arith.constant 0 : index
    %c0_12 = arith.constant 0 : index
    %c0_13 = arith.constant 0 : index
    %36 = vector.load %arg3[%c0_11, %c0_12, %c0_13] : memref<3x64x192xbf16, #tpu.memory_space<vmem>>, vector<1x64x192xbf16>
    %37 = vector.shape_cast %36 : vector<1x64x192xbf16> to vector<64x192xbf16>
    %c0_14 = arith.constant 0 : index
    %c0_15 = arith.constant 0 : index
    %38 = vector.load %arg6[%c0_14, %c0_15] : memref<192x288xbf16, #tpu.memory_space<vmem>>, vector<192x256xbf16>
    %cst_16 = arith.constant dense<0.000000e+00> : vector<64x256xf32>
    %39 = tpu.matmul %37, %38, %cst_16 {dimension_numbers = #tpu.dot_dimension_numbers<[1], [0], [0], [1], [0, 0, 1, 1], [], []>} : vector<64x192xbf16>, vector<192x256xbf16>, vector<64x256xf32> -> vector<64x256xf32>
    %c1 = arith.constant 1 : index
    %c0_17 = arith.constant 0 : index
    %c0_18 = arith.constant 0 : index
    %40 = vector.load %arg3[%c1, %c0_17, %c0_18] : memref<3x64x192xbf16, #tpu.memory_space<vmem>>, vector<1x64x192xbf16>
    %41 = vector.shape_cast %40 : vector<1x64x192xbf16> to vector<64x192xbf16>
    %c0_19 = arith.constant 0 : index
    %c16 = arith.constant 16 : index
    %42 = vector.load %arg6[%c0_19, %c16] : memref<192x288xbf16, #tpu.memory_space<vmem>>, vector<192x256xbf16>
    %cst_20 = arith.constant dense<0.000000e+00> : vector<64x256xf32>
    %43 = tpu.matmul %41, %42, %cst_20 {dimension_numbers = #tpu.dot_dimension_numbers<[1], [0], [0], [1], [0, 0, 1, 1], [], []>} : vector<64x192xbf16>, vector<192x256xbf16>, vector<64x256xf32> -> vector<64x256xf32>
    %44 = arith.addf %39, %43 : vector<64x256xf32>
    %c2 = arith.constant 2 : index
    %c0_21 = arith.constant 0 : index
    %c0_22 = arith.constant 0 : index
    %45 = vector.load %arg3[%c2, %c0_21, %c0_22] : memref<3x64x192xbf16, #tpu.memory_space<vmem>>, vector<1x64x192xbf16>
    %46 = vector.shape_cast %45 : vector<1x64x192xbf16> to vector<64x192xbf16>
    %c0_23 = arith.constant 0 : index
    %c32 = arith.constant 32 : index
    %47 = vector.load %arg6[%c0_23, %c32] : memref<192x288xbf16, #tpu.memory_space<vmem>>, vector<192x256xbf16>
    %cst_24 = arith.constant dense<0.000000e+00> : vector<64x256xf32>
    %48 = tpu.matmul %46, %47, %cst_24 {dimension_numbers = #tpu.dot_dimension_numbers<[1], [0], [0], [1], [0, 0, 1, 1], [], []>} : vector<64x192xbf16>, vector<192x256xbf16>, vector<64x256xf32> -> vector<64x256xf32>
    %49 = arith.addf %44, %48 : vector<64x256xf32>
    %c0_25 = arith.constant 0 : index
    %c0_26 = arith.constant 0 : index
    %50 = vector.load %arg4[%c0_25, %c0_26] : memref<64x1xf32, #tpu.memory_space<vmem>>, vector<64x1xf32>
    %51 = vector.broadcast %50 : vector<64x1xf32> to vector<64x256xf32>
    %52 = arith.addf %49, %51 : vector<64x256xf32>
    %cst_27 = arith.constant 0.000000e+00 : f32
    %53 = vector.broadcast %cst_27 : f32 to vector<64x256xf32>
    %54 = arith.maximumf %52, %53 : vector<64x256xf32>
    %c0_28 = arith.constant 0 : index
    %c0_29 = arith.constant 0 : index
    %c0_30 = arith.constant 0 : index
    %55 = vector.load %arg5[%c0_28, %c0_29, %c0_30] : memref<1x64x256xf32, #tpu.memory_space<vmem>>, vector<1x64x256xf32>
    %56 = vector.shape_cast %55 : vector<1x64x256xf32> to vector<64x256xf32>
    %57 = vector.shape_cast %54 : vector<64x256xf32> to vector<1x64x256xf32>
    tpu.vector_store %arg5[%c0_28, %c0_29, %c0_30], %57 {strides = array<i32>} : memref<1x64x256xf32, #tpu.memory_space<vmem>>, vector<1x64x256xf32>,
    return
  }
  func.func @transform_0(%arg0: i32, %arg1: i32) -> (i32, i32, i32, i32) {
    %c0_i32 = arith.constant 0 : i32
    %c0_i32_0 = arith.constant 0 : i32
    %c0_i32_1 = arith.constant 0 : i32
    return %arg0, %arg1, %c0_i32, %c0_i32_0 : i32, i32, i32, i32
  }
  func.func @transform_1(%arg0: i32, %arg1: i32) -> (i32, i32, i32) {
    %c0_i32 = arith.constant 0 : i32
    %c0_i32_0 = arith.constant 0 : i32
    %c0_i32_1 = arith.constant 0 : i32
    %c0_i32_2 = arith.constant 0 : i32
    return %c0_i32, %c0_i32_0, %c0_i32_1 : i32, i32, i32
  }
  func.func @transform_2(%arg0: i32, %arg1: i32) -> (i32, i32) {
    %c0_i32 = arith.constant 0 : i32
    %c0_i32_0 = arith.constant 0 : i32
    %c0_i32_1 = arith.constant 0 : i32
    return %c0_i32, %c0_i32_0 : i32, i32
  }
  func.func @transform_3(%arg0: i32, %arg1: i32) -> (i32, i32, i32) {
    %c0_i32 = arith.constant 0 : i32
    %c0_i32_0 = arith.constant 0 : i32
    return %arg0, %c0_i32, %arg1 : i32, i32, i32
  }
}

</mosaic_0001>

<bundles_post_ra>
// kernel: conv_relu_block.1
= control target key start
LH: loop header
LB: loop body
LE: loop exit
PB: predicated region body
PF: predicated region fallthrough
CT: control target
= control target key end

     0   :  { %s1866_s12 = smov 0   ;;  %s1868_s13 = smov 0   ;;  %s2644_s0 = inlined_call_operand.vmem [shape: bf16[2,1,64,320], index: 0, kind: input, shape index: {}]   ;;  %s2645_s1 = inlined_call_operand.vmem [shape: bf16[3,64,192], index: 1, kind: input, shape index: {}]   ;;  %s2646_s2 = inlined_call_operand.vmem [shape: f32[64,1], index: 2, kind: input, shape index: {}]   ;;  %s2647_s3 = inlined_call_operand.vmem [shape: f32[2,64,256], index: 3, kind: output, shape index: {}]  }
   0x1   :  { %s1870_s14 = smov 0  }
   0x2 LB: > { %s25_s15 = sadd.s32 1, %s1833_s13  ;;  %p1582_p0 = scmp.ge.s32.totalorder %s1837_s14, 1  ;;  %s1837_s14 = sphi %s1870_s14, %s13_s14   ;;  %s1833_s13 = sphi %s1868_s13, %s2653_s13   ;;  %s1829_s12 = sphi %s1866_s12, %s2652_s12  }
   0x3   : > { %p27_p1 = scmp.ge.s32.totalorder %s25_s15, 2  ;;  %p157_p2 = scmp.lt.s32.totalorder %s1837_s14, 3 }
   0x5   : > { %s2655_s15 = smov (%p27_p1, %s25_s15), 0  ;;  %p158_p3 = pnand %p1582_p0, %p157_p2 }
   0x6   : > { %v227_v0 = vlaneseq (!%p158_p3)  ;;  %p189_p4 = scmp.lt.s32.totalorder (!%p158_p3), %s1829_s12, 1  ;;  %v1839_v1 = vmov (!%p158_p3), 0   ;;  %s1840_s20 = smov (!%p158_p3), 112   ;;  %vm444_vm10 = vcmask (!%p158_p3), 261120   ;;  %vm285_vm11 = vcmask (!%p158_p3), 121856  }
   0x7   : > { %161 = sbr.rel (%p158_p3) target bundleno = 760 (0x2f8), region = 32  ;;  %1766 = vset.pattern.permute.xlu1 (!%p158_p3), %v1839_v1  ;;  %1765 = vset.pattern.permute.xlu0 (!%p158_p3), %v1839_v1  ;;  %s1841_s21 = smov (!%p158_p3), 15   ;;  %vm531_vm14 = vcmask (!%p158_p3), 916480   ;;  %vm324_vm15 = vcmask (!%p158_p3), 138240  }
   0x8   : > { %v228_v2 = vand.u32 (!%p158_p3), 127, %v227_v0  ;;  %s1842_s22 = smov (!%p158_p3), 17   ;;  %s1843_s23 = smov (!%p158_p3), 113  }
   0x9   : > { %s1844_s24 = smov (!%p158_p3), 111   ;;  %s1845_s25 = smov (!%p158_p3), 96  }
   0xa   : > { %v229_v3 = vadd.s32 (!%p158_p3), 128, %v228_v2  ;;  %v235_v4 = vand.u32 (!%p158_p3), 15, %v228_v2  ;;  %v230_v5 = vadd.s32 (!%p158_p3), 256, %v228_v2 }
   0xc   : > { %v242_v6 = vand.u32 (!%p158_p3), 15, %v229_v3  ;;  %vm267_vm0 = vcmp.eq.s32.totalorder (!%p158_p3), %v235_v4, 0  ;;  %v249_v7 = vand.u32 (!%p158_p3), 15, %v230_v5  ;;  %vm1898_vm1 = vcmp.eq.s32.totalorder (!%p158_p3), %v235_v4, 15 }
   0xe   : > { %s2657_s12 = smov (!%p189_p4, %s1829_s12), 1  ;;  %vm268_vm2 = vcmp.eq.s32.totalorder %v242_v6, 0  ;;  %vm269_vm3 = vcmp.eq.s32.totalorder %v249_v7, 0  ;;  %vm307_vm4 = vcmp.eq.s32.totalorder %v242_v6, 15  ;;  %vm1904_vm6 = vcmp.eq.s32.totalorder %v249_v7, 15 }
   0xf   : > { %s1733_s16 = smul.u32 96, %s2657_s12  ;;  %vm276_vm5 = vmpackc.low %vm268_vm2, %vm267_vm0  ;;  %vm421_vm2 = vcmask 924672  }
  0x10   : > { %v278_v13 = vsel %vm276_vm5, 65537, %v1839_v1  ;;  %vm277_vm7 = vmpackc.low %vm269_vm3, %vm269_vm3  ;;  %vm640_vm3 = vcmask 908288   ;;  %vm1242_vm5 = vcmask 785408  }
  0x11   : > { %s1890_s19 = scalar_lea.vmem %s2644_s0, %s1733_s16  ;;  %280 = vrot.lane.b32.xlu0 %v278_v13, %s1841_s21  ;;  %vm315_vm8 = vmpackc.low %vm307_vm4, %vm1898_vm1  ;;  %v279_v14 = vsel %vm277_vm7, 65537, %v1839_v1  ;;  %vm918_vm4 = vcmask 523264  }
  0x12   : > { %v1893_v8 = vld [vmem:[%s1890_s19 + $0x8] sm:$0xf]  ;;  %v1896_v9 = vld [vmem:[%s1890_s19 + $0x14] sm:$0xf]  ;;  %v1912_v15 = vld [vmem:[%s1890_s19] sm:$0xff]  ;;  %v317_v17 = vsel %vm315_vm8, 65537, %v1839_v1 }
  0x13   : > { %v1600_v11 = vcombine.low %v1893_v8, %v1896_v9  ;;  %v1915_v16 = vld [vmem:[%s1890_s19 + $0xc] sm:$0xff]  ;;  %vm316_vm9 = vmpackc.low %vm1904_vm6, %vm1904_vm6  ;;  %v1921_v18 = vld [vmem:[%s1890_s19 + $0x18] sm:$0xff] }
  0x14   : > { %v1924_v19 = vld [vmem:[%s1890_s19 + $0x24] sm:$0xff]  ;;  %v1599_v20 = vcombine.high %v1912_v15, %v1915_v16  ;;  %v318_v21 = vsel %vm316_vm9, 65537, %v1839_v1  ;;  %v1598_v23 = vcombine.low %v1912_v15, %v1915_v16  ;;  %v1934_v24 = vld [vmem:[%s1890_s19 + $0x20] sm:$0xf]  ;;  %v1937_v25 = vld [vmem:[%s1890_s19 + $0x2c] sm:$0xf] }
  0x15   : > { %511 = vrot.lane.b32.xlu1 %v1600_v11, %s1840_s20  ;;  %282 = vrot.lane.b32.xlu0 %v279_v14, %s1841_s21  ;;  %v1602_v22 = vcombine.high %v1921_v18, %v1924_v19  ;;  %v1601_v26 = vcombine.low %v1921_v18, %v1924_v19  ;;  %v1603_v27 = vcombine.low %v1934_v24, %v1937_v25  ;;  %v1946_v28 = vld [vmem:[%s1890_s19 + $0x38] sm:$0xf]  ;;  %v1949_v29 = vld [vmem:[%s1890_s19 + $0x44] sm:$0xf]  ;;  %s1676_s21 = sshll.u32 %s2657_s12, 7 }
  0x16   : > { %v1952_v30 = vld [vmem:[%s1890_s19 + $0x30] sm:$0xff]  ;;  %v1955_v31 = vld [vmem:[%s1890_s19 + $0x3c] sm:$0xff]  ;;  %v1606_v32 = vcombine.low %v1946_v28, %v1949_v29  ;;  %v1964_v34 = vld [vmem:[%s1890_s19 + $0x48] sm:$0xff] }
  0x17   : > { %v1605_v33 = vcombine.high %v1952_v30, %v1955_v31  ;;  %v1967_v35 = vld [vmem:[%s1890_s19 + $0x54] sm:$0xff]  ;;  %v1604_v37 = vcombine.low %v1952_v30, %v1955_v31  ;;  %v1976_v38 = vld [vmem:[%s1890_s19 + $0x50] sm:$0xf]  ;;  %v1979_v39 = vld [vmem:[%s1890_s19 + $0x5c] sm:$0xf] }
  0x18   : > { %v1608_v36 = vcombine.high %v1964_v34, %v1967_v35  ;;  %v1607_v40 = vcombine.low %v1964_v34, %v1967_v35  ;;  %v1609_v41 = vcombine.low %v1976_v38, %v1979_v39 }
  0x19   : > { %319 = vrot.lane.b32.xlu1 %v317_v17, %s1842_s22  ;;  %509 = vrot.lane.b32.xlu0 %v1599_v20, %s1840_s20 }
  0x1d   : > { %321 = vrot.lane.b32.xlu1 %v318_v21, %s1842_s22  ;;  %507 = vrot.lane.b32.xlu0 %v1598_v23, %s1840_s20 }
  0x21   : > { %515 = vrot.lane.b32.xlu1 %v1602_v22, %s1840_s20  ;;  %517 = vrot.lane.b32.xlu0 %v1603_v27, %s1840_s20 }
  0x25   : > { %513 = vrot.lane.b32.xlu1 %v1601_v26, %s1840_s20  ;;  %521 = vrot.lane.b32.xlu0 %v1605_v33, %s1840_s20 }
  0x29   : > { %523 = vrot.lane.b32.xlu1 %v1606_v32, %s1840_s20  ;;  %519 = vrot.lane.b32.xlu0 %v1604_v37, %s1840_s20 }
  0x2d   : > { %527 = vrot.lane.b32.xlu1 %v1608_v36, %s1840_s20  ;;  %529 = vrot.lane.b32.xlu0 %v1609_v41, %s1840_s20 }
  0x31   : > { %525 = vrot.lane.b32.xlu1 %v1607_v40, %s1840_s20 }
  0x83   : > { %v281_v43 = vpop.permute.xlu0 %280 }
  0x84   : > { %v284_v44 = vrot.slane %v281_v43, 4 }
  0x86   : > { %v286_v45 = vsel %vm285_vm11, %v284_v44, %v281_v43 }
  0x87   : > { %v512_v42 = vpop.permute.xlu1 %511  ;;  %vm288_vm12 = vcmp.ne.s16.totalorder %v286_v45, 0  ;;  %v283_v47 = vpop.permute.xlu0 %282 }
  0x88   : > { %554 = vst.msk [vmem:[#allocation2 + $0x70] sm:$0xff] %vm444_vm10, %v512_v42  ;;  %v287_v48 = vsel %vm285_vm11, %v284_v44, %v283_v47  ;;  %v290_v49 = vsel %vm288_vm12, 0, %v1912_v15  ;;  %v292_v50 = vsel %vm288_vm12, 0, %v1915_v16  ;;  %v294_v57 = vsel %vm288_vm12, 0, %v1921_v18 }
  0x89   : > { %vm289_vm13 = vcmp.ne.s16.totalorder %v287_v48, 0  ;;  %v1587_v51 = vcombine.high %v290_v49, %v292_v50  ;;  %v296_v58 = vsel %vm288_vm12, 0, %v1924_v19  ;;  %v1586_v60 = vcombine.low %v290_v49, %v292_v50 }
  0x8a   : > { %v291_v52 = vsel %vm289_vm13, 0, %v1893_v8  ;;  %v293_v53 = vsel %vm289_vm13, 0, %v1896_v9  ;;  %v295_v61 = vsel %vm289_vm13, 0, %v1934_v24  ;;  %v297_v62 = vsel %vm289_vm13, 0, %v1937_v25 }
  0x8b   : > { %v320_v46 = vpop.permute.xlu1 %319  ;;  %399 = vrot.lane.b32.xlu0 %v1587_v51, %s1843_s23  ;;  %v1588_v55 = vcombine.low %v291_v52, %v293_v53  ;;  %v510_v56 = vpop.permute.xlu0 %509  ;;  %v1590_v0 = vcombine.high %v294_v57, %v296_v58  ;;  %v1591_v2 = vcombine.low %v295_v61, %v297_v62  ;;  %v298_v4 = vsel %vm288_vm12, 0, %v1952_v30 }
  0x8c   : > { %v2004_v59 = vsel %vm531_vm14, %v510_v56, %v512_v42  ;;  %v300_v5 = vsel %vm288_vm12, 0, %v1955_v31  ;;  %v1589_v7 = vcombine.low %v294_v57, %v296_v58  ;;  %v323_v10 = vrot.slane %v320_v46, 4 }
  0x8d   : > { %401 = vrot.lane.b32.xlu1 %v1588_v55, %s1843_s23  ;;  %v299_v12 = vsel %vm289_vm13, 0, %v1946_v28  ;;  %v301_v13 = vsel %vm289_vm13, 0, %v1949_v29  ;;  %v1593_v14 = vcombine.high %v298_v4, %v300_v5  ;;  %v302_v26 = vsel %vm288_vm12, 0, %v1964_v34 }
  0x8e   : > { %v325_v20 = vsel %vm324_vm15, %v323_v10, %v320_v46  ;;  %v1594_v21 = vcombine.low %v299_v12, %v301_v13  ;;  %v304_v27 = vsel %vm288_vm12, 0, %v1967_v35  ;;  %v1592_v36 = vcombine.low %v298_v4, %v300_v5 }
  0x8f   : > { %v322_v54 = vpop.permute.xlu1 %321  ;;  %397 = vrot.lane.b32.xlu0 %v1586_v60, %s1843_s23  ;;  %v508_v1 = vpop.permute.xlu0 %507  ;;  %v303_v40 = vsel %vm289_vm13, 0, %v1976_v38  ;;  %v305_v41 = vsel %vm289_vm13, 0, %v1979_v39  ;;  %vm327_vm0 = vcmp.ne.s16.totalorder %v325_v20, 0  ;;  %v1596_v43 = vcombine.high %v302_v26, %v304_v27 }
  0x90   : > { %v2014_v3 = vsel %vm531_vm14, %v508_v1, %v510_v56  ;;  %v326_v37 = vsel %vm324_vm15, %v323_v10, %v322_v54  ;;  %v1597_v46 = vcombine.low %v303_v40, %v305_v41  ;;  %v329_v47 = vsel %vm327_vm0, 0, %v1912_v15 }
  0x91   : > { %405 = vrot.lane.b32.xlu1 %v1590_v0, %s1843_s23  ;;  %vm328_vm1 = vcmp.ne.s16.totalorder %v326_v37, 0  ;;  %v331_v48 = vsel %vm327_vm0, 0, %v1915_v16  ;;  %v1595_v50 = vcombine.low %v302_v26, %v304_v27  ;;  %v333_v56 = vsel %vm327_vm0, 0, %v1921_v18 }
  0x92   : > { %v330_v53 = vsel %vm328_vm1, 0, %v1893_v8  ;;  %v332_v54 = vsel %vm328_vm1, 0, %v1896_v9  ;;  %v1611_v16 = vcombine.high %v329_v47, %v331_v48  ;;  %v335_v8 = vsel %vm327_vm0, 0, %v1924_v19 }
  0x93   : > { %v516_v63 = vpop.permute.xlu1 %515  ;;  %407 = vrot.lane.b32.xlu0 %v1591_v2, %s1843_s23  ;;  %v518_v11 = vpop.permute.xlu0 %517  ;;  %v1612_v55 = vcombine.low %v330_v53, %v332_v54  ;;  %v1610_v9 = vcombine.low %v329_v47, %v331_v48  ;;  %v334_v57 = vsel %vm328_vm1, 0, %v1934_v24  ;;  %v336_v58 = vsel %vm328_vm1, 0, %v1937_v25 }
  0x94   : > { %557 = vst.msk [vmem:[#allocation2 + $0x88] sm:$0xff] %vm444_vm10, %v518_v11  ;;  %v2030_v23 = vsel %vm531_vm14, %v516_v63, %v518_v11  ;;  %v1614_v60 = vcombine.high %v333_v56, %v335_v8  ;;  %v1615_v61 = vcombine.low %v334_v57, %v336_v58  ;;  %v337_v18 = vsel %vm327_vm0, 0, %v1952_v30 }
  0x95   : > { %403 = vrot.lane.b32.xlu1 %v1589_v7, %s1843_s23  ;;  %v339_v19 = vsel %vm327_vm0, 0, %v1955_v31  ;;  %v1613_v62 = vcombine.low %v333_v56, %v335_v8  ;;  %v338_v24 = vsel %vm328_vm1, 0, %v1946_v28  ;;  %v340_v25 = vsel %vm328_vm1, 0, %v1949_v29 }
  0x96   : > { %v1618_v0 = vcombine.low %v338_v24, %v340_v25  ;;  %v341_v30 = vsel %vm327_vm0, 0, %v1964_v34  ;;  %v343_v31 = vsel %vm327_vm0, 0, %v1967_v35  ;;  %v1616_v1 = vcombine.low %v337_v18, %v339_v19  ;;  %v2111_v35 = vld [vmem:[#allocation2 + $0x70] sm:$0xff] }
  0x97   : > { %v514_v6 = vpop.permute.xlu1 %513  ;;  %411 = vrot.lane.b32.xlu0 %v1593_v14, %s1843_s23  ;;  %v522_v22 = vpop.permute.xlu0 %521  ;;  %v342_v28 = vsel %vm328_vm1, 0, %v1976_v38  ;;  %v344_v29 = vsel %vm328_vm1, 0, %v1979_v39  ;;  %v1620_v2 = vcombine.high %v341_v30, %v343_v31  ;;  %v1619_v34 = vcombine.low %v341_v30, %v343_v31 }
  0x98   : > { %v2038_v32 = vsel %vm531_vm14, %v514_v6, %v516_v63  ;;  %v1617_v63 = vcombine.high %v337_v18, %v339_v19  ;;  %v1621_v4 = vcombine.low %v342_v28, %v344_v29  ;;  %v1787_v29 = vld [vmem:[%s2645_s1 + $0x14] ss:$8 sps:$4 sm:$0xff]  }
  0x99   : > { %413 = vrot.lane.b32.xlu1 %v1594_v21, %s1843_s23 }
  0x9b   : > { %v524_v17 = vpop.permute.xlu1 %523  ;;  %409 = vrot.lane.b32.xlu0 %v1592_v36, %s1843_s23  ;;  %v520_v44 = vpop.permute.xlu0 %519  ;;  %v2106_v5 = vld [vmem:[#allocation2 + $0x88] sm:$0xff] }
  0x9c   : > { %560 = vst.msk [vmem:[#allocation2 + $0xa0] sm:$0xff] %vm444_vm10, %v524_v17  ;;  %v2041_v33 = vsel %vm531_vm14, %v522_v22, %v524_v17  ;;  %v2051_v45 = vsel %vm531_vm14, %v520_v44, %v522_v22 }
  0x9d   : > { %417 = vrot.lane.b32.xlu1 %v1596_v43, %s1843_s23 }
  0x9f   : > { %v528_v42 = vpop.permute.xlu1 %527  ;;  %419 = vrot.lane.b32.xlu0 %v1597_v46, %s1843_s23  ;;  %v530_v51 = vpop.permute.xlu0 %529 }
  0xa0   : > { %563 = vst.msk [vmem:[#allocation2 + $0xb8] sm:$0xff] %vm444_vm10, %v530_v51  ;;  %v2068_v15 = vsel %vm531_vm14, %v528_v42, %v530_v51 }
  0xa1   : > { %415 = vrot.lane.b32.xlu1 %v1595_v50, %s1843_s23 }
  0xa3   : > { %v526_v49 = vpop.permute.xlu1 %525  ;;  %618 = vrot.lane.b32.xlu0 %v1611_v16, %s1844_s24  ;;  %v2117_v39 = vld [vmem:[#allocation2 + $0xa0] sm:$0xff] }
  0xa4   : > { %v2060_v52 = vsel %vm531_vm14, %v526_v49, %v528_v42 }
  0xa5   : > { %620 = vrot.lane.b32.xlu1 %v1612_v55, %s1844_s24 }
  0xa7   : > { %616 = vrot.lane.b32.xlu0 %v1610_v9, %s1844_s24  ;;  %v2113_v38 = vld [vmem:[#allocation2 + $0xb8] sm:$0xff] }
  0xa9   : > { %624 = vrot.lane.b32.xlu1 %v1614_v60, %s1844_s24 }
  0xab   : > { %626 = vrot.lane.b32.xlu0 %v1615_v61, %s1844_s24 }
  0xad   : > { %622 = vrot.lane.b32.xlu1 %v1613_v62, %s1844_s24 }
  0xaf   : > { %630 = vrot.lane.b32.xlu0 %v1617_v63, %s1844_s24 }
  0xb1   : > { %632 = vrot.lane.b32.xlu1 %v1618_v0, %s1844_s24 }
  0xb3   : > { %628 = vrot.lane.b32.xlu0 %v1616_v1, %s1844_s24 }
  0xb5   : > { %636 = vrot.lane.b32.xlu1 %v1620_v2, %s1844_s24  ;;  %v1790_v2 = vld [vmem:[%s2645_s1 + $0x10] ss:$8 sps:$4 sm:$0xff]  }
  0xb7   : > { %638 = vrot.lane.b32.xlu0 %v1621_v4, %s1844_s24 }
  0xb9   : > { %634 = vrot.lane.b32.xlu1 %v1619_v34, %s1844_s24  ;;  %s2607_s24 = scalar_lea.vmem %s2647_s3, %s1676_s21 }
  0xbb   : > { %832 = vrot.lane.b32.xlu0 %v2106_v5, %s1840_s20 }
  0xbd   : > { %826 = vrot.lane.b32.xlu1 %v2111_v35, %s1840_s20 }
  0xbf   : > { %844 = vrot.lane.b32.xlu0 %v2113_v38, %s1840_s20 }
  0xc1   : > { %838 = vrot.lane.b32.xlu1 %v2117_v39, %s1840_s20 }
  0xc3   : > { %824 = vrot.lane.b32.xlu0 %v2004_v59, %s1840_s20 }
  0xc5   : > { %830 = vrot.lane.b32.xlu1 %v2030_v23, %s1840_s20 }
  0xc7   : > { %822 = vrot.lane.b32.xlu0 %v2014_v3, %s1840_s20 }
  0xc9   : > { %828 = vrot.lane.b32.xlu1 %v2038_v32, %s1840_s20 }
  0xcb   : > { %836 = vrot.lane.b32.xlu0 %v2041_v33, %s1840_s20 }
  0xcd   : > { %842 = vrot.lane.b32.xlu1 %v2068_v15, %s1840_s20 }
  0xcf   : > { %834 = vrot.lane.b32.xlu0 %v2051_v45, %s1840_s20 }
  0xd1   : > { %840 = vrot.lane.b32.xlu1 %v2060_v52, %s1840_s20 }
  0xfd   : > { %v400_v6 = vpop.permute.xlu0 %399 }
  0xff   : > { %v402_v7 = vpop.permute.xlu1 %401 }
 0x100   : > { %v2140_v10 = vsel %vm421_vm2, %v400_v6, %v402_v7  ;;  %445 = vst.msk [vmem:[#allocation2 + $0x10] sm:$0xff] %vm444_vm10, %v402_v7 }
 0x101   : > { %v398_v11 = vpop.permute.xlu0 %397  ;;  %1052 = vmatprep.subr.bf16.mxu0 %v2140_v10 }
 0x102   : > { %v2145_v12 = vsel %vm421_vm2, %v398_v11, %v400_v6 }
 0x103   : > { %v406_v13 = vpop.permute.xlu1 %405  ;;  %1053 = vmatpush1.bf16.msra.mxu0 %v2145_v12 }
 0x105   : > { %v408_v14 = vpop.permute.xlu0 %407 }
 0x106   : > { %v2149_v17 = vsel %vm421_vm2, %v406_v13, %v408_v14  ;;  %448 = vst.msk [vmem:[#allocation2 + $0x28] sm:$0xff] %vm444_vm10, %v408_v14 }
 0x107   : > { %v404_v20 = vpop.permute.xlu1 %403  ;;  %v2152_v21 = vld [vmem:[#allocation2 + $0x10] sm:$0xff]  ;;  %1054 = vmatprep.subr.bf16.mxu0 %v2149_v17 }
 0x108   : > { %v2156_v22 = vsel %vm421_vm2, %v404_v20, %v406_v13  ;;  %802 = vrot.lane.b32.xlu1 %v2152_v21, %s1840_s20 }
 0x109   : > { %v412_v26 = vpop.permute.xlu0 %411  ;;  %1055 = vmatpush1.bf16.msra.mxu0 %v2156_v22 }
 0x10b   : > { %v414_v27 = vpop.permute.xlu1 %413 }
 0x10c   : > { %v2162_v36 = vsel %vm421_vm2, %v412_v26, %v414_v27  ;;  %451 = vst.msk [vmem:[#allocation2 + $0x40] sm:$0xff] %vm444_vm10, %v414_v27 }
 0x10d   : > { %v410_v37 = vpop.permute.xlu0 %409  ;;  %v2165_v40 = vld [vmem:[#allocation2 + $0x28] sm:$0xff]  ;;  %1056 = vmatprep.subr.bf16.mxu0 %v2162_v36 }
 0x10e   : > { %v2169_v41 = vsel %vm421_vm2, %v410_v37, %v412_v26  ;;  %808 = vrot.lane.b32.xlu0 %v2165_v40, %s1840_s20  ;;  %v1392_v26 = vld [vmem:[%s2646_s2] sm:$0xff] }
 0x10f   : > { %v418_v42 = vpop.permute.xlu1 %417  ;;  %1057 = vmatpush1.bf16.msra.mxu0 %v2169_v41 }
 0x111   : > { %v420_v43 = vpop.permute.xlu0 %419 }
 0x112   : > { %v2175_v44 = vsel %vm421_vm2, %v418_v42, %v420_v43  ;;  %454 = vst.msk [vmem:[#allocation2 + $0x58] sm:$0xff] %vm444_vm10, %v420_v43 }
 0x113   : > { %v416_v46 = vpop.permute.xlu1 %415  ;;  %v716_v47 = vld [vmem:[#allocation2 + $0x40] sm:$0xff]  ;;  %1058 = vmatprep.subr.bf16.mxu0 %v2175_v44 }
 0x114   : > { %v2180_v48 = vsel %vm421_vm2, %v416_v46, %v418_v42  ;;  %814 = vrot.lane.b32.xlu1 %v716_v47, %s1840_s20  ;;  %v1396_v42 = vld [vmem:[%s2646_s2 + $0x20] sm:$0xff] }
 0x115   : > { %v619_v49 = vpop.permute.xlu0 %618  ;;  %1059 = vmatpush1.bf16.msra.mxu0 %v2180_v48 }
 0x116   : > { %1060 = vmatprep.subr.bf16.mxu0 %v2004_v59 }
 0x117   : > { %v621_v50 = vpop.permute.xlu1 %620 }
 0x118   : > { %v2186_v51 = vsel %vm640_vm3, %v619_v49, %v621_v50  ;;  %663 = vst.msk [vmem:[#allocation2 + $0xd0] sm:$0xff] %vm444_vm10, %v621_v50 }
 0x119   : > { %v617_v53 = vpop.permute.xlu0 %616  ;;  %v717_v54 = vld [vmem:[#allocation2 + $0x58] sm:$0xff]  ;;  %1061 = vmatpush1.bf16.msra.mxu0 %v2014_v3 }
 0x11a   : > { %v2191_v16 = vsel %vm640_vm3, %v617_v53, %v619_v49  ;;  %820 = vrot.lane.b32.xlu0 %v717_v54, %s1840_s20  ;;  %1062 = vmatprep.subr.bf16.mxu0 %v2030_v23  ;;  %v1399_v49 = vld [vmem:[%s2646_s2 + $0x38] sm:$0xff] }
 0x11b   : > { %v625_v55 = vpop.permute.xlu1 %624 }
 0x11d   : > { %v627_v56 = vpop.permute.xlu0 %626  ;;  %1063 = vmatpush1.bf16.msra.mxu0 %v2038_v32 }
 0x11e   : > { %v2197_v8 = vsel %vm640_vm3, %v625_v55, %v627_v56  ;;  %666 = vst.msk [vmem:[#allocation2 + $0xe8] sm:$0xff] %vm444_vm10, %v627_v56  ;;  %1064 = vmatprep.subr.bf16.mxu0 %v2041_v33 }
 0x11f   : > { %v623_v9 = vpop.permute.xlu1 %622  ;;  %v2201_v57 = vld [vmem:[#allocation2 + $0xd0] sm:$0xff] }
 0x120   : > { %v2204_v58 = vsel %vm640_vm3, %v623_v9, %v625_v55  ;;  %850 = vrot.lane.b32.xlu1 %v2201_v57, %s1840_s20 }
 0x121   : > { %v631_v60 = vpop.permute.xlu0 %630  ;;  %1065 = vmatpush1.bf16.msra.mxu0 %v2051_v45 }
 0x122   : > { %1066 = vmatprep.subr.bf16.mxu0 %v2068_v15 }
 0x123   : > { %v633_v61 = vpop.permute.xlu1 %632 }
 0x124   : > { %v2211_v18 = vsel %vm640_vm3, %v631_v60, %v633_v61  ;;  %669 = vst.msk [vmem:[#allocation2 + $0x100] sm:$0xff] %vm444_vm10, %v633_v61 }
 0x125   : > { %v629_v19 = vpop.permute.xlu0 %628  ;;  %v2214_v62 = vld [vmem:[#allocation2 + $0xe8] sm:$0xff]  ;;  %1067 = vmatpush1.bf16.msra.mxu0 %v2060_v52 }
 0x126   : > { %v2218_v24 = vsel %vm640_vm3, %v629_v19, %v631_v60  ;;  %856 = vrot.lane.b32.xlu0 %v2214_v62, %s1840_s20  ;;  %1068 = vmatprep.subr.bf16.mxu0 %v2186_v51 }
 0x127   : > { %v637_v25 = vpop.permute.xlu1 %636 }
 0x129   : > { %v639_v63 = vpop.permute.xlu0 %638  ;;  %1069 = vmatpush1.bf16.msra.mxu0 %v2191_v16 }
 0x12a   : > { %v2225_v0 = vsel %vm640_vm3, %v637_v25, %v639_v63  ;;  %672 = vst.msk [vmem:[#allocation2 + $0x118] sm:$0xff] %vm444_vm10, %v639_v63  ;;  %1070 = vmatprep.subr.bf16.mxu0 %v2197_v8 }
 0x12b   : > { %v635_v30 = vpop.permute.xlu1 %634  ;;  %v2229_v31 = vld [vmem:[#allocation2 + $0x100] sm:$0xff] }
 0x12c   : > { %v2232_v1 = vsel %vm640_vm3, %v635_v30, %v637_v25  ;;  %862 = vrot.lane.b32.xlu1 %v2229_v31, %s1840_s20 }
 0x12d   : > { %1071 = vmatpush1.bf16.msra.mxu0 %v2204_v58  ;;  %v2332_v4 = vpop.permute.xlu0 %832 }
 0x12e   : > { %1072 = vmatprep.subr.bf16.mxu0 %v2211_v18 }
 0x130   : > { %1174 = vrot.lane.b32.xlu1 %v2152_v21, %s1845_s25 }
 0x131   : > { %v2240_v28 = vld [vmem:[#allocation2 + $0x118] sm:$0xff]  ;;  %1073 = vmatpush1.bf16.msra.mxu0 %v2218_v24 }
 0x132   : > { %868 = vrot.lane.b32.xlu0 %v2240_v28, %s1840_s20  ;;  %1074 = vmatprep.subr.bf16.mxu0 %v2225_v0 }
 0x134   : > { %1186 = vrot.lane.b32.xlu1 %v716_v47, %s1845_s25  ;;  %v1398_v47 = vld [vmem:[%s2646_s2 + $0x30] sm:$0xff] }
 0x135   : > { %1075 = vmatpush1.bf16.msra.mxu0 %v2232_v1 }
 0x136   : > { %1180 = vrot.lane.b32.xlu0 %v2165_v40, %s1845_s25  ;;  %v1395_v40 = vld [vmem:[%s2646_s2 + $0x18] sm:$0xff] }
 0x138   : > { %806 = vrot.lane.b32.xlu1 %v2149_v17, %s1840_s20 }
 0x13a   : > { %800 = vrot.lane.b32.xlu0 %v2140_v10, %s1840_s20 }
 0x13c   : > { %804 = vrot.lane.b32.xlu1 %v2156_v22, %s1840_s20 }
 0x13e   : > { %798 = vrot.lane.b32.xlu0 %v2145_v12, %s1840_s20 }
 0x140   : > { %818 = vrot.lane.b32.xlu1 %v2175_v44, %s1840_s20 }
 0x142   : > { %812 = vrot.lane.b32.xlu0 %v2162_v36, %s1840_s20 }
 0x144   : > { %816 = vrot.lane.b32.xlu1 %v2180_v48, %s1840_s20 }
 0x146   : > { %810 = vrot.lane.b32.xlu0 %v2169_v41, %s1840_s20 }
 0x148   : > { %1198 = vrot.lane.b32.xlu1 %v2111_v35, %s1845_s25 }
 0x14a   : > { %1192 = vrot.lane.b32.xlu0 %v717_v54, %s1845_s25 }
 0x14c   : > { %1202 = vrot.lane.b32.xlu1 %v2030_v23, %s1845_s25  ;;  %v1784_v23 = vld [vmem:[%s2645_s1 + $0x4] ss:$8 sps:$4 sm:$0xff]  }
 0x14d   : > { %1650 = vmatprep.mubr.msk.bf16.mxu0 %vm918_vm4, %v1784_v23 }
 0x14e   : > { %1196 = vrot.lane.b32.xlu0 %v2004_v59, %s1845_s25  ;;  %v1781_v59 = vld [vmem:[%s2645_s1 + $0x44] ss:$8 sps:$4 sm:$0xff]  }
 0x14f   : > { %1638 = vmatprep.mubr.msk.bf16.mxu1 %vm918_vm4, %v1781_v59 }
 0x150   : > { %1200 = vrot.lane.b32.xlu1 %v2038_v32, %s1845_s25  ;;  %v2320_v32 = vpop.permute.xlu1 %826 }
 0x152   : > { %1194 = vrot.lane.b32.xlu0 %v2014_v3, %s1845_s25  ;;  %v1782_v3 = vld [vmem:[%s2645_s1] ss:$8 sps:$4 sm:$0xff]  }
 0x153   : > { %1085 = vmatmul.mubr.bf16.vlgmr.msra.gmra.mrb[0].mxu0 %v1782_v3 }
 0x154   : > { %854 = vrot.lane.b32.xlu1 %v2197_v8, %s1840_s20  ;;  %v2334_v34 = vpop.permute.xlu1 %838  ;;  %1651 = vmatprep.mubr.msk.bf16.mxu0 %vm918_vm4, %v1787_v29 }
 0x156   : > { %1204 = vrot.lane.b32.xlu0 %v2106_v5, %s1845_s25  ;;  %v2343_v5 = vpop.permute.xlu0 %844 }
 0x158   : > { %852 = vrot.lane.b32.xlu1 %v2204_v58, %s1840_s20  ;;  %v2345_v35 = vpop.permute.xlu1 %830 }
 0x159   : > { %v881_v59 = vsel %vm531_vm14, %v2345_v35, %v2332_v4 }
 0x15a   : > { %848 = vrot.lane.b32.xlu0 %v2186_v51, %s1840_s20 }
 0x15b   : > { %1095 = vmatmul.mubr.bf16.gmra.mrb[4].mxu0 %v1790_v2 }
 0x15c   : > { %866 = vrot.lane.b32.xlu1 %v2225_v0, %s1840_s20 }
 0x15e   : > { %846 = vrot.lane.b32.xlu0 %v2191_v16, %s1840_s20 }
 0x160   : > { %864 = vrot.lane.b32.xlu1 %v2232_v1, %s1840_s20 }
 0x162   : > { %860 = vrot.lane.b32.xlu0 %v2211_v18, %s1840_s20 }
 0x164   : > { %1178 = vrot.lane.b32.xlu1 %v2149_v17, %s1845_s25 }
 0x166   : > { %858 = vrot.lane.b32.xlu0 %v2218_v24, %s1840_s20 }
 0x168   : > { %1176 = vrot.lane.b32.xlu1 %v2156_v22, %s1845_s25  ;;  %v1393_v22 = vld [vmem:[%s2646_s2 + $0x8] sm:$0xff] }
 0x16a   : > { %1172 = vrot.lane.b32.xlu0 %v2140_v10, %s1845_s25 }
 0x16c   : > { %1210 = vrot.lane.b32.xlu1 %v2117_v39, %s1845_s25  ;;  %v1799_v39 = vld [vmem:[%s2645_s1 + $0x34] ss:$8 sps:$4 sm:$0xff]  }
 0x16e   : > { %1170 = vrot.lane.b32.xlu0 %v2145_v12, %s1845_s25  ;;  %v1805_v12 = vld [vmem:[%s2645_s1 + $0x84] ss:$8 sps:$4 sm:$0xff]  }
 0x170   : > { %1190 = vrot.lane.b32.xlu1 %v2175_v44, %s1845_s25  ;;  %v1397_v44 = vld [vmem:[%s2646_s2 + $0x28] sm:$0xff] }
 0x172   : > { %1184 = vrot.lane.b32.xlu0 %v2162_v36, %s1845_s25  ;;  %v1394_v36 = vld [vmem:[%s2646_s2 + $0x10] sm:$0xff] }
 0x174   : > { %1188 = vrot.lane.b32.xlu1 %v2180_v48, %s1845_s25 }
 0x176   : > { %1182 = vrot.lane.b32.xlu0 %v2169_v41, %s1845_s25 }
 0x178   : > { %1214 = vrot.lane.b32.xlu1 %v2068_v15, %s1845_s25  ;;  %v1793_v15 = vld [vmem:[%s2645_s1 + $0x24] ss:$8 sps:$4 sm:$0xff]  }
 0x179   : > { %1652 = vmatprep.mubr.msk.bf16.mxu0 %vm918_vm4, %v1793_v15 }
 0x17a   : > { %1208 = vrot.lane.b32.xlu0 %v2041_v33, %s1845_s25  ;;  %v1796_v33 = vld [vmem:[%s2645_s1 + $0x20] ss:$8 sps:$4 sm:$0xff]  }
 0x17b   : > { %1105 = vmatmul.mubr.bf16.gmra.mrb[8].mxu0 %v1796_v33 }
 0x17c   : > { %1212 = vrot.lane.b32.xlu1 %v2060_v52, %s1845_s25  ;;  %v2360_v52 = vpop.permute.xlu0 %824  ;;  %1653 = vmatprep.mubr.msk.bf16.mxu0 %vm918_vm4, %v1799_v39 }
 0x17d   : > { %v879_v30 = vsel %vm531_vm14, %v2360_v52, %v2320_v32 }
 0x17e   : > { %1206 = vrot.lane.b32.xlu0 %v2051_v45, %s1845_s25  ;;  %v2362_v45 = vpop.permute.xlu1 %828 }
 0x17f   : > { %v880_v23 = vsel %vm531_vm14, %v2362_v45, %v2345_v35 }
 0x180   : > { %1222 = vrot.lane.b32.xlu1 %v2201_v57, %s1845_s25  ;;  %v2379_v7 = vpop.permute.xlu0 %822 }
 0x182   : > { %1216 = vrot.lane.b32.xlu0 %v2113_v38, %s1845_s25  ;;  %v2371_v6 = vpop.permute.xlu1 %842  ;;  %v1802_v38 = vld [vmem:[%s2645_s1 + $0x30] ss:$8 sps:$4 sm:$0xff]  }
 0x183   : > { %1115 = vmatmul.mubr.bf16.gmra.mrb[12].mxu0 %v1802_v38  ;;  %v885_v33 = vsel %vm531_vm14, %v2371_v6, %v2343_v5 }
 0x184   : > { %1234 = vrot.lane.b32.xlu1 %v2229_v31, %s1845_s25  ;;  %v2385_v10 = vpop.permute.xlu0 %836  ;;  %1670 = vmatprep.mubr.msk.bf16.mxu0 %vm918_vm4, %v1805_v12 }
 0x185   : > { %v883_v29 = vsel %vm531_vm14, %v2385_v10, %v2334_v34 }
 0x186   : > { %1228 = vrot.lane.b32.xlu0 %v2214_v62, %s1845_s25  ;;  %v2387_v11 = vpop.permute.xlu1 %840 }
 0x188   : > { %1226 = vrot.lane.b32.xlu1 %v2197_v8, %s1845_s25  ;;  %v2399_v14 = vpop.permute.xlu0 %834 }
 0x189   : > { %v882_v4 = vsel %vm531_vm14, %v2399_v14, %v2385_v10 }
 0x18a   : > { %1220 = vrot.lane.b32.xlu0 %v2186_v51, %s1845_s25  ;;  %v803_v13 = vpop.permute.xlu1 %802 }
 0x18c   : > { %1224 = vrot.lane.b32.xlu1 %v2204_v58, %s1845_s25  ;;  %v809_v20 = vpop.permute.xlu0 %808 }
 0x18e   : > { %1218 = vrot.lane.b32.xlu0 %v2191_v16, %s1845_s25  ;;  %v815_v17 = vpop.permute.xlu1 %814 }
 0x190   : > { %1238 = vrot.lane.b32.xlu1 %v2225_v0, %s1845_s25  ;;  %v821_v27 = vpop.permute.xlu0 %820 }
 0x192   : > { %1232 = vrot.lane.b32.xlu0 %v2211_v18, %s1845_s25  ;;  %v2405_v21 = vpop.permute.xlu1 %850 }
 0x194   : > { %1236 = vrot.lane.b32.xlu1 %v2232_v1, %s1845_s25  ;;  %v878_v1 = vsel %vm531_vm14, %v2379_v7, %v2360_v52  ;;  %v884_v52 = vsel %vm531_vm14, %v2387_v11, %v2371_v6 }
 0x196   : > { %1230 = vrot.lane.b32.xlu0 %v2218_v24, %s1845_s25 }
 0x198   : > { %1407 = vperm.xlu1 %1766, %v1393_v22   ;;  %v2423_v41 = vpop.permute.xlu0 %856 }
 0x19a   : > { %1240 = vrot.lane.b32.xlu0 %v2240_v28, %s1845_s25 }
 0x19c   : > { %1412 = vperm.xlu1 %1766, %v1394_v36  }
 0x19e   : > { %v2418_v37 = vpop.permute.xlu1 %862  ;;  %1402 = vperm.xlu0 %1765, %v1392_v26  }
 0x1a0   : > { %1422 = vperm.xlu1 %1766, %v1396_v42  }
 0x1a2   : > { %v2428_v43 = vpop.permute.xlu1 %1174  ;;  %1417 = vperm.xlu0 %1765, %v1395_v40   ;;  %v1785_v40 = vld [vmem:[%s2645_s1 + $0x54] ss:$8 sps:$4 sm:$0xff]  }
 0x1a4   : > { %v2433_v46 = vpop.permute.xlu0 %868  ;;  %1432 = vperm.xlu1 %1766, %v1398_v47  }
 0x1a6   : > { %v2438_v48 = vpop.permute.xlu1 %1186  ;;  %1427 = vperm.xlu0 %1765, %v1397_v44  }
 0x1a8   : > { %v2443_v50 = vpop.permute.xlu0 %1180 }
 0x1aa   : > { %v807_v51 = vpop.permute.xlu1 %806  ;;  %1437 = vperm.xlu0 %1765, %v1399_v49   ;;  %v1789_v49 = vld [vmem:[%s2645_s1 + $0x50] ss:$8 sps:$4 sm:$0xff]  }
 0x1ab   : > { %v873_v9 = vsel %vm531_vm14, %v807_v51, %v809_v20 }
 0x1ac   : > { %v801_v53 = vpop.permute.xlu0 %800 }
 0x1ad   : > { %v871_v54 = vsel %vm531_vm14, %v801_v53, %v803_v13 }
 0x1ae   : > { %v805_v16 = vpop.permute.xlu1 %804  ;;  %931 = vmatprep.subr.bf16.mxu1 %v871_v54 }
 0x1af   : > { %v872_v58 = vsel %vm531_vm14, %v805_v16, %v807_v51 }
 0x1b0   : > { %v799_v55 = vpop.permute.xlu0 %798 }
 0x1b1   : > { %v870_v56 = vsel %vm531_vm14, %v799_v55, %v801_v53  ;;  %v1791_v53 = vld [vmem:[%s2645_s1 + $0x64] ss:$8 sps:$4 sm:$0xff]  }
 0x1b2   : > { %v819_v8 = vpop.permute.xlu1 %818  ;;  %932 = vmatpush1.bf16.msra.mxu1 %v870_v56 }
 0x1b3   : > { %933 = vmatprep.subr.bf16.mxu1 %v873_v9  ;;  %v877_v24 = vsel %vm531_vm14, %v819_v8, %v821_v27  ;;  %v1779_v27 = vld [vmem:[%s2645_s1 + $0x40] ss:$8 sps:$4 sm:$0xff]  }
 0x1b4   : > { %v813_v57 = vpop.permute.xlu0 %812 }
 0x1b5   : > { %v875_v60 = vsel %vm531_vm14, %v813_v57, %v815_v17 }
 0x1b6   : > { %v817_v61 = vpop.permute.xlu1 %816  ;;  %934 = vmatpush1.bf16.msra.mxu1 %v872_v58 }
 0x1b7   : > { %935 = vmatprep.subr.bf16.mxu1 %v875_v60  ;;  %v876_v63 = vsel %vm531_vm14, %v817_v61, %v819_v8  ;;  %v1795_v8 = vld [vmem:[%s2645_s1 + $0x60] ss:$8 sps:$4 sm:$0xff]   ;;  %v1797_v60 = vld [vmem:[%s2645_s1 + $0x74] ss:$8 sps:$4 sm:$0xff]  }
 0x1b8   : > { %v811_v18 = vpop.permute.xlu0 %810 }
 0x1b9   : > { %v874_v19 = vsel %vm531_vm14, %v811_v18, %v813_v57 }
 0x1ba   : > { %v2451_v62 = vpop.permute.xlu1 %1198  ;;  %936 = vmatpush1.bf16.msra.mxu1 %v874_v19 }
 0x1bb   : > { %937 = vmatprep.subr.bf16.mxu1 %v877_v24 }
 0x1bc   : > { %v2454_v25 = vpop.permute.xlu0 %1192 }
 0x1be   : > { %v2457_v0 = vpop.permute.xlu1 %1202  ;;  %938 = vmatpush1.bf16.msra.mxu1 %v876_v63 }
 0x1bf   : > { %939 = vmatprep.subr.bf16.mxu1 %v879_v30 }
 0x1c0   : > { %v2462_v31 = vpop.permute.xlu0 %1196 }
 0x1c1   : > { %v1252_v57 = vsel %vm1242_vm5, %v2462_v31, %v2451_v62 }
 0x1c2   : > { %v2467_v28 = vpop.permute.xlu1 %1200  ;;  %940 = vmatpush1.bf16.msra.mxu1 %v878_v1  ;;  %v1808_v1 = vld [vmem:[%s2645_s1 + $0xa4] ss:$8 sps:$4 sm:$0xff]  }
 0x1c3   : > { %941 = vmatprep.subr.bf16.mxu1 %v881_v59  ;;  %v1253_v24 = vsel %vm1242_vm5, %v2467_v28, %v2457_v0 }
 0x1c4   : > { %v2472_v3 = vpop.permute.xlu0 %1194 }
 0x1c5   : > { %v1251_v61 = vsel %vm1242_vm5, %v2472_v3, %v2462_v31 }
 0x1c6   : > { %v855_v32 = vpop.permute.xlu1 %854  ;;  %942 = vmatpush1.bf16.msra.mxu1 %v880_v23 }
 0x1c7   : > { %943 = vmatprep.subr.bf16.mxu1 %v883_v29  ;;  %v889_v5 = vsel %vm531_vm14, %v855_v32, %v2423_v41 }
 0x1c8   : > { %v2480_v2 = vpop.permute.xlu0 %1204 }
 0x1c9   : > { %v1254_v19 = vsel %vm1242_vm5, %v2457_v0, %v2480_v2 }
 0x1ca   : > { %v853_v15 = vpop.permute.xlu1 %852  ;;  %944 = vmatpush1.bf16.msra.mxu1 %v882_v4 }
 0x1cb   : > { %945 = vmatprep.subr.bf16.mxu1 %v885_v33  ;;  %v888_v12 = vsel %vm531_vm14, %v853_v15, %v855_v32 }
 0x1cc   : > { %v849_v35 = vpop.permute.xlu0 %848 }
 0x1cd   : > { %v887_v34 = vsel %vm531_vm14, %v849_v35, %v2405_v21 }
 0x1ce   : > { %v867_v45 = vpop.permute.xlu1 %866  ;;  %946 = vmatpush1.bf16.msra.mxu1 %v884_v52 }
 0x1cf   : > { %947 = vmatprep.subr.bf16.mxu1 %v887_v34  ;;  %v893_v20 = vsel %vm531_vm14, %v867_v45, %v2433_v46 }
 0x1d0   : > { %v847_v39 = vpop.permute.xlu0 %846 }
 0x1d1   : > { %v886_v38 = vsel %vm531_vm14, %v847_v39, %v849_v35 }
 0x1d2   : > { %v865_v7 = vpop.permute.xlu1 %864  ;;  %948 = vmatpush1.bf16.msra.mxu1 %v886_v38 }
 0x1d3   : > { %949 = vmatprep.subr.bf16.mxu1 %v889_v5  ;;  %v892_v22 = vsel %vm531_vm14, %v865_v7, %v867_v45 }
 0x1d4   : > { %v861_v10 = vpop.permute.xlu0 %860 }
 0x1d5   : > { %v891_v6 = vsel %vm531_vm14, %v861_v10, %v2418_v37 }
 0x1d6   : > { %v1179_v11 = vpop.permute.xlu1 %1178  ;;  %950 = vmatpush1.bf16.msra.mxu1 %v888_v12  ;;  %v1803_v12 = vld [vmem:[%s2645_s1 + $0x80] ss:$8 sps:$4 sm:$0xff]  }
 0x1d7   : > { %951 = vmatprep.subr.bf16.mxu1 %v891_v6  ;;  %v1806_v6 = vld [vmem:[%s2645_s1 + $0xa0] ss:$8 sps:$4 sm:$0xff]  }
 0x1d8   : > { %v859_v13 = vpop.permute.xlu0 %858 }
 0x1d9   : > { %v890_v14 = vsel %vm531_vm14, %v859_v13, %v861_v10  ;;  %v1811_v13 = vld [vmem:[%s2645_s1 + $0xb4] ss:$8 sps:$4 sm:$0xff]  }
 0x1da   : > { %v1177_v17 = vpop.permute.xlu1 %1176  ;;  %952 = vmatpush1.bf16.msra.mxu1 %v890_v14  ;;  %v1813_v14 = vld [vmem:[%s2645_s1 + $0x90] ss:$8 sps:$4 sm:$0xff]  }
 0x1db   : > { %953 = vmatprep.subr.bf16.mxu1 %v893_v20  ;;  %v1245_v46 = vsel %vm1242_vm5, %v1177_v17, %v1179_v11  ;;  %v1814_v17 = vld [vmem:[%s2645_s1 + $0xb0] ss:$8 sps:$4 sm:$0xff]  }
 0x1dc   : > { %v1173_v21 = vpop.permute.xlu0 %1172 }
 0x1dd   : > { %v1244_v26 = vsel %vm1242_vm5, %v1173_v21, %v2428_v43  ;;  %v1246_v43 = vsel %vm1242_vm5, %v1179_v11, %v2443_v50  ;;  %v1809_v11 = vld [vmem:[%s2645_s1 + $0x94] ss:$8 sps:$4 sm:$0xff]  }
 0x1de   : > { %v1211_v36 = vpop.permute.xlu1 %1210  ;;  %954 = vmatpush1.bf16.msra.mxu1 %v892_v22  ;;  %1303 = vmatprep.subr.bf16.mxu0 %v1244_v26 }
 0x1df   : > { %1677 = vmatprep.subr.bf16.mxu1 %v1244_v26 }
 0x1e0   : > { %v1171_v37 = vpop.permute.xlu0 %1170 }
 0x1e1   : > { %v1243_v41 = vsel %vm1242_vm5, %v1171_v37, %v1173_v21  ;;  %964 = vmatmul.mubr.bf16.vlgmr.msra.gmra.mrb[0].mxu1 %v1779_v27 }
 0x1e2   : > { %v1191_v42 = vpop.permute.xlu1 %1190  ;;  %1304 = vmatpush1.bf16.msra.mxu0 %v1243_v41  ;;  %1689 = vmatpush1.bf16.msra.mxu1 %v1243_v41 }
 0x1e3   : > { %1305 = vmatprep.subr.bf16.mxu0 %v1246_v43  ;;  %1678 = vmatprep.subr.bf16.mxu1 %v1246_v43 }
 0x1e4   : > { %v1185_v44 = vpop.permute.xlu0 %1184  ;;  %1639 = vmatprep.mubr.msk.bf16.mxu1 %vm918_vm4, %v1785_v40 }
 0x1e5   : > { %v1248_v47 = vsel %vm1242_vm5, %v1185_v44, %v2438_v48  ;;  %v1250_v48 = vsel %vm1242_vm5, %v1191_v42, %v2454_v25  ;;  %v1801_v25 = vld [vmem:[%s2645_s1 + $0x70] ss:$8 sps:$4 sm:$0xff]  }
 0x1e6   : > { %v1189_v51 = vpop.permute.xlu1 %1188  ;;  %1306 = vmatpush1.bf16.msra.mxu0 %v1245_v46  ;;  %1690 = vmatpush1.bf16.msra.mxu1 %v1245_v46 }
 0x1e7   : > { %1307 = vmatprep.subr.bf16.mxu0 %v1248_v47  ;;  %1679 = vmatprep.subr.bf16.mxu1 %v1248_v47  ;;  %v1249_v56 = vsel %vm1242_vm5, %v1189_v51, %v1191_v42 }
 0x1e8   : > { %v1183_v50 = vpop.permute.xlu0 %1182 }
 0x1e9   : > { %v1247_v54 = vsel %vm1242_vm5, %v1183_v50, %v1185_v44  ;;  %974 = vmatmul.mubr.bf16.gmra.mrb[4].mxu1 %v1789_v49 }
 0x1ea   : > { %v1215_v16 = vpop.permute.xlu1 %1214  ;;  %1308 = vmatpush1.bf16.msra.mxu0 %v1247_v54  ;;  %1691 = vmatpush1.bf16.msra.mxu1 %v1247_v54 }
 0x1eb   : > { %1309 = vmatprep.subr.bf16.mxu0 %v1250_v48  ;;  %1680 = vmatprep.subr.bf16.mxu1 %v1250_v48 }
 0x1ec   : > { %v1209_v55 = vpop.permute.xlu0 %1208  ;;  %1640 = vmatprep.mubr.msk.bf16.mxu1 %vm918_vm4, %v1791_v53 }
 0x1ed   : > { %v1256_v30 = vsel %vm1242_vm5, %v1209_v55, %v1211_v36 }
 0x1ee   : > { %v1213_v9 = vpop.permute.xlu1 %1212  ;;  %1310 = vmatpush1.bf16.msra.mxu0 %v1249_v56  ;;  %1692 = vmatpush1.bf16.msra.mxu1 %v1249_v56 }
 0x1ef   : > { %1311 = vmatprep.subr.bf16.mxu0 %v1252_v57  ;;  %1681 = vmatprep.subr.bf16.mxu1 %v1252_v57  ;;  %v1257_v23 = vsel %vm1242_vm5, %v1213_v9, %v1215_v16 }
 0x1f0   : > { %v1207_v58 = vpop.permute.xlu0 %1206 }
 0x1f1   : > { %984 = vmatmul.mubr.bf16.gmra.mrb[8].mxu1 %v1795_v8  ;;  %v1255_v59 = vsel %vm1242_vm5, %v1207_v58, %v1209_v55 }
 0x1f2   : > { %v1223_v18 = vpop.permute.xlu1 %1222  ;;  %1312 = vmatpush1.bf16.msra.mxu0 %v1251_v61  ;;  %1693 = vmatpush1.bf16.msra.mxu1 %v1251_v61 }
 0x1f3   : > { %1313 = vmatprep.subr.bf16.mxu0 %v1254_v19  ;;  %1682 = vmatprep.subr.bf16.mxu1 %v1254_v19 }
 0x1f4   : > { %v1217_v62 = vpop.permute.xlu0 %1216  ;;  %1641 = vmatprep.mubr.msk.bf16.mxu1 %vm918_vm4, %v1797_v60 }
 0x1f5   : > { %v1258_v28 = vsel %vm1242_vm5, %v1215_v16, %v1217_v62 }
 0x1f6   : > { %v1235_v63 = vpop.permute.xlu1 %1234  ;;  %1314 = vmatpush1.bf16.msra.mxu0 %v1253_v24  ;;  %1694 = vmatpush1.bf16.msra.mxu1 %v1253_v24 }
 0x1f7   : > { %1315 = vmatprep.subr.bf16.mxu0 %v1256_v30  ;;  %1683 = vmatprep.subr.bf16.mxu1 %v1256_v30 }
 0x1f8   : > { %v1229_v31 = vpop.permute.xlu0 %1228 }
 0x1f9   : > { %994 = vmatmul.mubr.bf16.gmra.mrb[12].mxu1 %v1801_v25 }
 0x1fa   : > { %v1227_v0 = vpop.permute.xlu1 %1226  ;;  %1316 = vmatpush1.bf16.msra.mxu0 %v1255_v59  ;;  %1695 = vmatpush1.bf16.msra.mxu1 %v1255_v59 }
 0x1fb   : > { %1317 = vmatprep.subr.bf16.mxu0 %v1258_v28  ;;  %1684 = vmatprep.subr.bf16.mxu1 %v1258_v28  ;;  %v1262_v15 = vsel %vm1242_vm5, %v1227_v0, %v1229_v31 }
 0x1fc   : > { %v1221_v3 = vpop.permute.xlu0 %1220  ;;  %1672 = vmatprep.mubr.msk.bf16.mxu1 %vm918_vm4, %v1808_v1 }
 0x1fd   : > { %v1260_v32 = vsel %vm1242_vm5, %v1221_v3, %v1223_v18 }
 0x1fe   : > { %1318 = vmatpush1.bf16.msra.mxu0 %v1257_v23  ;;  %1696 = vmatpush1.bf16.msra.mxu1 %v1257_v23  ;;  %v1225_v29 = vpop.permute.xlu1 %1224 }
 0x1ff   : > { %1319 = vmatprep.subr.bf16.mxu0 %v1260_v32  ;;  %1685 = vmatprep.subr.bf16.mxu1 %v1260_v32  ;;  %v1261_v35 = vsel %vm1242_vm5, %v1225_v29, %v1227_v0 }
 0x200   : > { %v1219_v2 = vpop.permute.xlu0 %1218 }
 0x201   : > { %v1259_v4 = vsel %vm1242_vm5, %v1219_v2, %v1221_v3 }
 0x202   : > { %1320 = vmatpush1.bf16.msra.mxu0 %v1259_v4  ;;  %1697 = vmatpush1.bf16.msra.mxu1 %v1259_v4  ;;  %v1239_v52 = vpop.permute.xlu1 %1238 }
 0x203   : > { %1321 = vmatprep.subr.bf16.mxu0 %v1262_v15  ;;  %1686 = vmatprep.subr.bf16.mxu1 %v1262_v15 }
 0x204   : > { %v1233_v33 = vpop.permute.xlu0 %1232 }
 0x205   : > { %v1264_v34 = vsel %vm1242_vm5, %v1233_v33, %v1235_v63 }
 0x206   : > { %1322 = vmatpush1.bf16.msra.mxu0 %v1261_v35  ;;  %1698 = vmatpush1.bf16.msra.mxu1 %v1261_v35  ;;  %v1237_v38 = vpop.permute.xlu1 %1236 }
 0x207   : > { %1323 = vmatprep.subr.bf16.mxu0 %v1264_v34  ;;  %1687 = vmatprep.subr.bf16.mxu1 %v1264_v34  ;;  %v1265_v10 = vsel %vm1242_vm5, %v1237_v38, %v1239_v52 }
 0x208   : > { %v1231_v45 = vpop.permute.xlu0 %1230 }
 0x209   : > { %v1263_v39 = vsel %vm1242_vm5, %v1231_v45, %v1233_v33 }
 0x20a   : > { %1324 = vmatpush1.bf16.msra.mxu0 %v1263_v39  ;;  %1699 = vmatpush1.bf16.msra.mxu1 %v1263_v39 }
 0x20c   : > { %v1241_v7 = vpop.permute.xlu0 %1240 }
 0x20d   : > { %v1266_v5 = vsel %vm1242_vm5, %v1239_v52, %v1241_v7 }
 0x20e   : > { %1325 = vmatprep.subr.bf16.mxu0 %v1266_v5  ;;  %1688 = vmatprep.subr.bf16.mxu1 %v1266_v5 }
 0x20f   : > { %1326 = vmatpush1.bf16.msra.mxu0 %v1265_v10  ;;  %1700 = vmatpush1.bf16.msra.mxu1 %v1265_v10 }
 0x212   : > { %1336 = vmatmul.mubr.bf16.vlgmr.msra.gmra.mrb[0].mxu0 %v1803_v12  ;;  %1356 = vmatmul.mubr.bf16.vlgmr.msra.gmra.mrb[16].mxu1 %v1806_v6 }
 0x213   : > { %1671 = vmatprep.mubr.msk.bf16.mxu0 %vm918_vm4, %v1809_v11  ;;  %1673 = vmatprep.mubr.msk.bf16.mxu1 %vm918_vm4, %v1811_v13 }
 0x217   : > { %v1408_v24 = vpop.permute.xlu1 %1407 }
 0x21a   : > { %1346 = vmatmul.mubr.bf16.gmra.mrb[4].mxu0 %v1813_v14  ;;  %1366 = vmatmul.mubr.bf16.gmra.mrb[20].mxu1 %v1814_v17 }
 0x21b   : > { %v2599_v63 = vpop.permute.xlu1 %1412 }
 0x21d   : > { %v1403_v25 = vpop.permute.xlu0 %1402 }
 0x21f   : > { %v1423_v31 = vpop.permute.xlu1 %1422 }
 0x221   : > { %v2601_v30 = vpop.permute.xlu0 %1417 }
 0x225   : > { %v1428_v39 = vpop.permute.xlu0 %1427 }
 0x24e   : > { %v1106_v20 = vpop.f32.mrb[8].mxu0 }
 0x24f   : > { %v1108_v21 = vpop.f32.mrb[9].mxu0 }
 0x250   : > { %v1110_v22 = vpop.f32.mrb[10].mxu0 }
 0x251   : > { %v1112_v26 = vpop.f32.mrb[11].mxu0 }
 0x256   : > { %v1116_v27 = vpop.f32.mrb[12].mxu0 }
 0x257   : > { %v1118_v36 = vpop.f32.mrb[13].mxu0 }
 0x258   : > { %v1120_v37 = vpop.f32.mrb[14].mxu0 }
 0x259   : > { %v1122_v40 = vpop.f32.mrb[15].mxu0 }
 0x2b4   : > { %v965_v41 = vpop.f32.mrb[0].mxu1 }
 0x2b5   : > { %v967_v42 = vpop.f32.mrb[1].mxu1 }
 0x2b6   : > { %v969_v43 = vpop.f32.mrb[2].mxu1 }
 0x2b7   : > { %v971_v44 = vpop.f32.mrb[3].mxu1 }
 0x2bc   : > { %v2587_v46 = vpop.f32.mrb[4].mxu1 }
 0x2bd   : > { %v2589_v47 = vpop.f32.mrb[5].mxu1 }
 0x2be   : > { %v2591_v49 = vpop.f32.mrb[6].mxu1 }
 0x2bf   : > { %v2593_v51 = vpop.f32.mrb[7].mxu1 }
 0x2c4   : > { %v985_v50 = vpop.f32.mrb[8].mxu1 }
 0x2c5   : > { %v1107_v53 = vadd.f32 %v1106_v20, %v985_v50  ;;  %v987_v54 = vpop.f32.mrb[9].mxu1 }
 0x2c6   : > { %v1109_v16 = vadd.f32 %v1108_v21, %v987_v54  ;;  %v989_v48 = vpop.f32.mrb[10].mxu1 }
 0x2c7   : > { %v1111_v55 = vadd.f32 %v1110_v22, %v989_v48  ;;  %v991_v56 = vpop.f32.mrb[11].mxu1  ;;  %v1433_v22 = vpop.permute.xlu1 %1432 }
 0x2c8   : > { %v1113_v8 = vadd.f32 %v1112_v26, %v991_v56 }
 0x2cc   : > { %v995_v9 = vpop.f32.mrb[12].mxu1 }
 0x2cd   : > { %v1117_v57 = vadd.f32 %v1116_v27, %v995_v9  ;;  %v997_v58 = vpop.f32.mrb[13].mxu1 }
 0x2ce   : > { %v1119_v60 = vadd.f32 %v1118_v36, %v997_v58  ;;  %v999_v61 = vpop.f32.mrb[14].mxu1 }
 0x2cf   : > { %v2595_v18 = vadd.f32 %v1120_v37, %v999_v61  ;;  %v1001_v19 = vpop.f32.mrb[15].mxu1 }
 0x2d0   : > { %v2597_v62 = vadd.f32 %v1122_v40, %v1001_v19 }
 0x2e5   : > { %v1337_v1 = vpop.f32.mrb[0].mxu0  ;;  %v1357_v59 = vpop.f32.mrb[16].mxu1 }
 0x2e6   : > { %v1701_v0 = vadd.f32 %v1337_v1, %v965_v41  ;;  %v1384_v28 = vadd.f32 %v1357_v59, %v1107_v53  ;;  %v1339_v3 = vpop.f32.mrb[1].mxu0  ;;  %v1359_v23 = vpop.f32.mrb[17].mxu1 }
 0x2e7   : > { %v1702_v32 = vadd.f32 %v1339_v3, %v967_v42  ;;  %v1385_v29 = vadd.f32 %v1359_v23, %v1109_v16  ;;  %v1341_v2 = vpop.f32.mrb[2].mxu0  ;;  %v1361_v4 = vpop.f32.mrb[18].mxu1 }
 0x2e8   : > { %v1440_v15 = vadd.f32 %v1701_v0, %v1403_v25  ;;  %v1448_v33 = vadd.f32 %v1423_v31, %v1384_v28  ;;  %v1703_v35 = vadd.f32 %v1341_v2, %v969_v43  ;;  %v1386_v52 = vadd.f32 %v1361_v4, %v1111_v55  ;;  %v1343_v34 = vpop.f32.mrb[3].mxu0  ;;  %v1363_v45 = vpop.f32.mrb[19].mxu1 }
 0x2e9   : > { %v1441_v38 = vadd.f32 %v1702_v32, %v1403_v25  ;;  %v1449_v7 = vadd.f32 %v1423_v31, %v1385_v29  ;;  %v1704_v5 = vadd.f32 %v1343_v34, %v971_v44  ;;  %v1387_v10 = vadd.f32 %v1363_v45, %v1113_v8 }
 0x2ea   : > { %v1456_v12 = vmax.f32 %v1440_v15, 0.0  ;;  %v1464_v6 = vmax.f32 %v1448_v33, 0.0  ;;  %v1442_v11 = vadd.f32 %v1703_v35, %v1408_v24  ;;  %v1450_v13 = vadd.f32 %v1428_v39, %v1386_v52 }
 0x2eb   : > { %v1457_v14 = vmax.f32 %v1441_v38, 0.0  ;;  %v1465_v17 = vmax.f32 %v1449_v7, 0.0  ;;  %v1443_v20 = vadd.f32 %v1704_v5, %v1408_v24  ;;  %v1451_v21 = vadd.f32 %v1428_v39, %v1387_v10 }
 0x2ec   : > { %1472 = vst [vmem:[%s2607_s24] sm:$0xff] %v1456_v12  ;;  %1480 = vst [vmem:[%s2607_s24 + $0x40] sm:$0xff] %v1464_v6  ;;  %v1458_v26 = vmax.f32 %v1442_v11, 0.0  ;;  %v1466_v27 = vmax.f32 %v1450_v13, 0.0 }
 0x2ed   : > { %1473 = vst [vmem:[%s2607_s24 + $0x8] sm:$0xff] %v1457_v14  ;;  %1481 = vst [vmem:[%s2607_s24 + $0x48] sm:$0xff] %v1465_v17  ;;  %v1459_v36 = vmax.f32 %v1443_v20, 0.0  ;;  %v1467_v37 = vmax.f32 %v1451_v21, 0.0  ;;  %v1347_v40 = vpop.f32.mrb[4].mxu0  ;;  %v1367_v41 = vpop.f32.mrb[20].mxu1 }
 0x2ee   : > { %1474 = vst [vmem:[%s2607_s24 + $0x10] sm:$0xff] %v1458_v26  ;;  %1482 = vst [vmem:[%s2607_s24 + $0x50] sm:$0xff] %v1466_v27  ;;  %v1705_v42 = vadd.f32 %v1347_v40, %v2587_v46  ;;  %v1388_v43 = vadd.f32 %v1367_v41, %v1117_v57  ;;  %v1349_v44 = vpop.f32.mrb[5].mxu0  ;;  %v1369_v50 = vpop.f32.mrb[21].mxu1 }
 0x2ef   : > { %1475 = vst [vmem:[%s2607_s24 + $0x18] sm:$0xff] %v1459_v36  ;;  %1483 = vst [vmem:[%s2607_s24 + $0x58] sm:$0xff] %v1467_v37  ;;  %v1706_v53 = vadd.f32 %v1349_v44, %v2589_v47  ;;  %v1389_v54 = vadd.f32 %v1369_v50, %v1119_v60  ;;  %v1351_v16 = vpop.f32.mrb[6].mxu0  ;;  %v1371_v48 = vpop.f32.mrb[22].mxu1 }
 0x2f0   : > { %v1444_v55 = vadd.f32 %v1705_v42, %v2599_v63  ;;  %v1452_v56 = vadd.f32 %v1433_v22, %v1388_v43  ;;  %v1707_v8 = vadd.f32 %v1351_v16, %v2591_v49  ;;  %v1390_v9 = vadd.f32 %v1371_v48, %v2595_v18  ;;  %v1353_v58 = vpop.f32.mrb[7].mxu0  ;;  %v1373_v46 = vpop.f32.mrb[23].mxu1 }
 0x2f1   : > { %v1438_v57 = vpop.permute.xlu0 %1437  ;;  %v1445_v61 = vadd.f32 %v1706_v53, %v2599_v63  ;;  %v1453_v19 = vadd.f32 %v1433_v22, %v1389_v54  ;;  %v1708_v47 = vadd.f32 %v1353_v58, %v2593_v51  ;;  %v1391_v60 = vadd.f32 %v1373_v46, %v2597_v62 }
 0x2f2   : > { %v1460_v24 = vmax.f32 %v1444_v55, 0.0  ;;  %v1468_v25 = vmax.f32 %v1452_v56, 0.0  ;;  %v1446_v49 = vadd.f32 %v1707_v8, %v2601_v30  ;;  %v1454_v18 = vadd.f32 %v1438_v57, %v1390_v9 }
 0x2f3   : > { %v1461_v31 = vmax.f32 %v1445_v61, 0.0  ;;  %v1469_v1 = vmax.f32 %v1453_v19, 0.0  ;;  %v1447_v63 = vadd.f32 %v1708_v47, %v2601_v30  ;;  %v1455_v59 = vadd.f32 %v1438_v57, %v1391_v60 }
 0x2f4   : > { %1476 = vst [vmem:[%s2607_s24 + $0x20] sm:$0xff] %v1460_v24  ;;  %1484 = vst [vmem:[%s2607_s24 + $0x60] sm:$0xff] %v1468_v25  ;;  %v1462_v0 = vmax.f32 %v1446_v49, 0.0  ;;  %v1470_v51 = vmax.f32 %v1454_v18, 0.0 }
 0x2f5   : > { %1477 = vst [vmem:[%s2607_s24 + $0x28] sm:$0xff] %v1461_v31  ;;  %1485 = vst [vmem:[%s2607_s24 + $0x68] sm:$0xff] %v1469_v1  ;;  %v1463_v62 = vmax.f32 %v1447_v63, 0.0  ;;  %v1471_v28 = vmax.f32 %v1455_v59, 0.0 }
 0x2f6   : > { %1478 = vst [vmem:[%s2607_s24 + $0x30] sm:$0xff] %v1462_v0  ;;  %1486 = vst [vmem:[%s2607_s24 + $0x70] sm:$0xff] %v1470_v51 }
 0x2f7   : > { %1479 = vst [vmem:[%s2607_s24 + $0x38] sm:$0xff] %v1463_v62  ;;  %1487 = vst [vmem:[%s2607_s24 + $0x78] sm:$0xff] %v1471_v28 }
 0x2f8 PF: > { %s13_s14 = sadd.s32 1, %s1837_s14   ;;  %s2652_s12 = smov %s1833_s13 }
 0x2f9   : > { %p10_p5 = scmp.ge.s32.totalorder %s13_s14, 4   ;;  %s2653_s13 = smov %s2655_s15 }
 0x2fb   :  { %12 = sbr.rel (!%p10_p5) target bundleno = 2 (0x2), region = 64 }

</bundles_post_ra>
